<compile_context>
chip_gen: v7x
topology: tpu7x:2x2x1
jax: 0.10.0
libtpu: 0.0.40
codegen_flags: <defaults>
</compile_context>

<pallas_src>
import jax
import jax.numpy as jnp
from jax.experimental import pallas as pl
from jax.experimental.pallas import tpu as pltpu


def _round_up(n, m):
    return ((n + m - 1) // m) * m


def _post_encoder_mlp_kernel(x_ref, w1_ref, b1_ref,
                             w2mu_ref, b2mu_ref,
                             w2sg_ref, b2sg_ref,
                             mu_ref, sigma_ref):
    x = x_ref[...]                                                  # [TM, IN_p]

    # First Linear + Tanh (MXU matmul, f32 accumulate).
    h = jnp.dot(x, w1_ref[...], preferred_element_type=jnp.float32) + b1_ref[...]
    h = jnp.tanh(h)                                                 # [TM, H_p]

    # Second Linear, split into mu / sigma halves -> two lane-dense writes,
    # no lane-axis slicing inside the kernel.
    mu = jnp.dot(h, w2mu_ref[...], preferred_element_type=jnp.float32) + b2mu_ref[...]
    s = jnp.dot(h, w2sg_ref[...], preferred_element_type=jnp.float32) + b2sg_ref[...]

    # Softplus with PyTorch's numerical behavior (threshold=20: identity above).
    # The jnp.minimum guard keeps the untaken where-branch from overflowing.
    sigma = jnp.where(s > 20.0, s, jnp.log1p(jnp.exp(jnp.minimum(s, 20.0))))

    mu_ref[...] = mu.astype(mu_ref.dtype)
    sigma_ref[...] = sigma.astype(sigma_ref.dtype)


def post_encoder_mlp(x, w1, b1, w2, b2, *, block_b=None):
    """PostEncoderMLP forward.

    x : [B, input_size]
    w1: [input_size, hidden]   (transposed vs. PyTorch Linear weight)
    b1: [1, hidden] or [hidden]
    w2: [hidden, 2*hidden]     (transposed vs. PyTorch Linear weight)
    b2: [1, 2*hidden] or [2*hidden]
    returns (mu [B, hidden], sigma [B, hidden]), both float32.
    """
    B, IN = x.shape
    H = w1.shape[1]
    assert w2.shape == (H, 2 * H)
    b1 = b1.reshape(1, H)
    b2 = b2.reshape(1, 2 * H)

    # Lane/sublane-aligned padded shapes.
    IN_p = _round_up(IN, 128)
    H_p = _round_up(H, 128)
    if block_b is None:
        block_b = min(512, _round_up(B, 8))          # batch tile, multiple of 8
    B_p = _round_up(B, block_b)

    f32 = jnp.float32
    xp = jnp.zeros((B_p, IN_p), f32).at[:B, :IN].set(x.astype(f32))
    w1p = jnp.zeros((IN_p, H_p), f32).at[:IN, :H].set(w1.astype(f32))
    b1p = jnp.zeros((1, H_p), f32).at[:, :H].set(b1.astype(f32))
    w2mu = jnp.zeros((H_p, H_p), f32).at[:H, :H].set(w2[:, :H].astype(f32))
    w2sg = jnp.zeros((H_p, H_p), f32).at[:H, :H].set(w2[:, H:].astype(f32))
    b2mu = jnp.zeros((1, H_p), f32).at[:, :H].set(b2[:, :H].astype(f32))
    b2sg = jnp.zeros((1, H_p), f32).at[:, :H].set(b2[:, H:].astype(f32))

    grid = (B_p // block_b,)

    # Batch tile is streamed; weights/biases are resident (constant index_map).
    x_spec = pl.BlockSpec((block_b, IN_p), lambda i: (i, 0))
    w1_spec = pl.BlockSpec((IN_p, H_p), lambda i: (0, 0))
    b_spec = pl.BlockSpec((1, H_p), lambda i: (0, 0))
    w2_spec = pl.BlockSpec((H_p, H_p), lambda i: (0, 0))
    out_spec = pl.BlockSpec((block_b, H_p), lambda i: (i, 0))

    # VMEM budget: double-buffered x + two outputs, plus (conservatively x2)
    # resident weights/biases.  Cap well under v7x's 64 MiB physical VMEM.
    bpe = 4
    tile_bytes = 2 * block_b * (IN_p + 2 * H_p) * bpe
    weight_bytes = 2 * (IN_p * H_p + 2 * H_p * H_p + 3 * H_p) * bpe
    vmem_limit = int(min(max(2 * (tile_bytes + weight_bytes), 16 << 20), 48 << 20))

    cost = pl.CostEstimate(
        flops=2 * B_p * (IN_p * H_p + 2 * H_p * H_p),
        transcendentals=3 * B_p * H_p,                     # tanh + exp + log1p
        bytes_accessed=(B_p * IN_p + IN_p * H_p + 2 * H_p * H_p + 3 * H_p
                        + 2 * B_p * H_p) * bpe,
    )

    mu_p, sigma_p = pl.pallas_call(
        _post_encoder_mlp_kernel,
        grid=grid,
        in_specs=[x_spec, w1_spec, b_spec, w2_spec, b_spec, w2_spec, b_spec],
        out_specs=(out_spec, out_spec),
        out_shape=(
            jax.ShapeDtypeStruct((B_p, H_p), jnp.float32),
            jax.ShapeDtypeStruct((B_p, H_p), jnp.float32),
        ),
        compiler_params=pltpu.CompilerParams(
            dimension_semantics=("parallel",),
            vmem_limit_bytes=vmem_limit,
        ),
        cost_estimate=cost,
    )(xp, w1p, b1p, w2mu, b2mu, w2sg, b2sg)

    # Drop the zero padding (plain XLA slices, outside the kernel).
    return mu_p[:B, :H], sigma_p[:B, :H]


def _reference(x, w1, b1, w2, b2, hidden):
    h = jnp.tanh(x @ w1 + b1)
    out = h @ w2 + b2
    mu = out[:, :hidden]
    sigma = jax.nn.softplus(out[:, hidden:])
    return mu, sigma


if __name__ == "__main__":
    B = 2
    INPUT_SIZE = 16
    HIDDEN = 32

    key = jax.random.PRNGKey(0)
    kx, k1, k2, k3, k4 = jax.random.split(key, 5)

    # Deterministic synthetic parameters (PyTorch-style uniform fan-in init).
    bound1 = 1.0 / (INPUT_SIZE ** 0.5)
    bound2 = 1.0 / (HIDDEN ** 0.5)
    x = jax.random.normal(kx, (B, INPUT_SIZE), dtype=jnp.float32)
    w1 = jax.random.uniform(k1, (INPUT_SIZE, HIDDEN), minval=-bound1,
                            maxval=bound1, dtype=jnp.float32)
    b1 = jax.random.uniform(k2, (1, HIDDEN), minval=-bound1, maxval=bound1,
                            dtype=jnp.float32)
    w2 = jax.random.uniform(k3, (HIDDEN, 2 * HIDDEN), minval=-bound2,
                            maxval=bound2, dtype=jnp.float32)
    b2 = jax.random.uniform(k4, (1, 2 * HIDDEN), minval=-bound2, maxval=bound2,
                            dtype=jnp.float32)

    mu, sigma = post_encoder_mlp(x, w1, b1, w2, b2)
    jax.block_until_ready((mu, sigma))

    mu_ref, sigma_ref = _reference(x, w1, b1, w2, b2, HIDDEN)
    assert mu.shape == (B, HIDDEN) and sigma.shape == (B, HIDDEN)
    assert jnp.allclose(mu, mu_ref, atol=1e-4, rtol=1e-4)
    assert jnp.allclose(sigma, sigma_ref, atol=1e-4, rtol=1e-4)

    print("KERNEL_OK")
</pallas_src>

<mosaic_0001>
module attributes {stable_mosaic.version = 11 : i64} {
  func.func @_post_encoder_mlp_kernel(%arg0: i32, %arg1: memref<8x128xf32, #tpu.memory_space<vmem>>, %arg2: memref<128x128xf32, #tpu.memory_space<vmem>>, %arg3: memref<1x128xf32, #tpu.memory_space<vmem>>, %arg4: memref<128x128xf32, #tpu.memory_space<vmem>>, %arg5: memref<1x128xf32, #tpu.memory_space<vmem>>, %arg6: memref<128x128xf32, #tpu.memory_space<vmem>>, %arg7: memref<1x128xf32, #tpu.memory_space<vmem>>, %arg8: memref<8x128xf32, #tpu.memory_space<vmem>>, %arg9: memref<8x128xf32, #tpu.memory_space<vmem>>) attributes {dimension_semantics = [#tpu.dimension_semantics<parallel>], iteration_bounds = array<i64: 1>, scalar_prefetch = 0 : i64, scratch_operands = 0 : i64, tpu.core_type = #tpu.core_type<tc>, window_params = [{transform_indices = @transform_0, window_bounds = array<i64: 8, 128>}, {pipeline_mode = #tpu.pipeline_mode<synchronous>, transform_indices = @transform_1, window_bounds = array<i64: 128, 128>}, {pipeline_mode = #tpu.pipeline_mode<synchronous>, transform_indices = @transform_2, window_bounds = array<i64: 1, 128>}, {pipeline_mode = #tpu.pipeline_mode<synchronous>, transform_indices = @transform_3, window_bounds = array<i64: 128, 128>}, {pipeline_mode = #tpu.pipeline_mode<synchronous>, transform_indices = @transform_4, window_bounds = array<i64: 1, 128>}, {pipeline_mode = #tpu.pipeline_mode<synchronous>, transform_indices = @transform_5, window_bounds = array<i64: 128, 128>}, {pipeline_mode = #tpu.pipeline_mode<synchronous>, transform_indices = @transform_6, window_bounds = array<i64: 1, 128>}, {transform_indices = @transform_7, window_bounds = array<i64: 8, 128>}, {transform_indices = @transform_8, window_bounds = array<i64: 8, 128>}]} {
    %c0 = arith.constant 0 : index
    %c0_0 = arith.constant 0 : index
    %0 = vector.load %arg1[%c0, %c0_0] : memref<8x128xf32, #tpu.memory_space<vmem>>, vector<8x128xf32>
    %c0_1 = arith.constant 0 : index
    %c0_2 = arith.constant 0 : index
    %1 = vector.load %arg2[%c0_1, %c0_2] : memref<128x128xf32, #tpu.memory_space<vmem>>, vector<128x128xf32>
    %cst = arith.constant dense<0.000000e+00> : vector<8x128xf32>
    %2 = tpu.matmul %0, %1, %cst {dimension_numbers = #tpu.dot_dimension_numbers<[1], [0], [0], [1], [0, 0, 1, 1], [], []>} : vector<8x128xf32>, vector<128x128xf32>, vector<8x128xf32> -> vector<8x128xf32>
    %c0_3 = arith.constant 0 : index
    %c0_4 = arith.constant 0 : index
    %3 = vector.load %arg3[%c0_3, %c0_4] : memref<1x128xf32, #tpu.memory_space<vmem>>, vector<1x128xf32>
    %4 = vector.broadcast %3 : vector<1x128xf32> to vector<8x128xf32>
    %5 = arith.addf %2, %4 : vector<8x128xf32>
    %6 = math.tanh %5 : vector<8x128xf32>
    %c0_5 = arith.constant 0 : index
    %c0_6 = arith.constant 0 : index
    %7 = vector.load %arg4[%c0_5, %c0_6] : memref<128x128xf32, #tpu.memory_space<vmem>>, vector<128x128xf32>
    %cst_7 = arith.constant dense<0.000000e+00> : vector<8x128xf32>
    %8 = tpu.matmul %6, %7, %cst_7 {dimension_numbers = #tpu.dot_dimension_numbers<[1], [0], [0], [1], [0, 0, 1, 1], [], []>} : vector<8x128xf32>, vector<128x128xf32>, vector<8x128xf32> -> vector<8x128xf32>
    %c0_8 = arith.constant 0 : index
    %c0_9 = arith.constant 0 : index
    %9 = vector.load %arg5[%c0_8, %c0_9] : memref<1x128xf32, #tpu.memory_space<vmem>>, vector<1x128xf32>
    %10 = vector.broadcast %9 : vector<1x128xf32> to vector<8x128xf32>
    %11 = arith.addf %8, %10 : vector<8x128xf32>
    %c0_10 = arith.constant 0 : index
    %c0_11 = arith.constant 0 : index
    %12 = vector.load %arg6[%c0_10, %c0_11] : memref<128x128xf32, #tpu.memory_space<vmem>>, vector<128x128xf32>
    %cst_12 = arith.constant dense<0.000000e+00> : vector<8x128xf32>
    %13 = tpu.matmul %6, %12, %cst_12 {dimension_numbers = #tpu.dot_dimension_numbers<[1], [0], [0], [1], [0, 0, 1, 1], [], []>} : vector<8x128xf32>, vector<128x128xf32>, vector<8x128xf32> -> vector<8x128xf32>
    %c0_13 = arith.constant 0 : index
    %c0_14 = arith.constant 0 : index
    %14 = vector.load %arg7[%c0_13, %c0_14] : memref<1x128xf32, #tpu.memory_space<vmem>>, vector<1x128xf32>
    %15 = vector.broadcast %14 : vector<1x128xf32> to vector<8x128xf32>
    %16 = arith.addf %13, %15 : vector<8x128xf32>
    %cst_15 = arith.constant 2.000000e+01 : f32
    %17 = vector.broadcast %cst_15 : f32 to vector<8x128xf32>
    %18 = arith.cmpf ogt, %16, %17 : vector<8x128xf32>
    %cst_16 = arith.constant 2.000000e+01 : f32
    %19 = vector.broadcast %cst_16 : f32 to vector<8x128xf32>
    %20 = arith.minimumf %16, %19 : vector<8x128xf32>
    %21 = math.exp %20 : vector<8x128xf32>
    %22 = math.log1p %21 : vector<8x128xf32>
    %23 = arith.select %18, %16, %22 : vector<8x128xi1>, vector<8x128xf32>
    %c0_17 = arith.constant 0 : index
    %c0_18 = arith.constant 0 : index
    %24 = vector.load %arg8[%c0_17, %c0_18] : memref<8x128xf32, #tpu.memory_space<vmem>>, vector<8x128xf32>
    tpu.vector_store %arg8[%c0_17, %c0_18], %11 {strides = array<i32>} : memref<8x128xf32, #tpu.memory_space<vmem>>, vector<8x128xf32>,
    %c0_19 = arith.constant 0 : index
    %c0_20 = arith.constant 0 : index
    %25 = vector.load %arg9[%c0_19, %c0_20] : memref<8x128xf32, #tpu.memory_space<vmem>>, vector<8x128xf32>
    tpu.vector_store %arg9[%c0_19, %c0_20], %23 {strides = array<i32>} : memref<8x128xf32, #tpu.memory_space<vmem>>, vector<8x128xf32>,
    return
  }
  func.func @transform_0(%arg0: i32) -> (i32, i32) {
    %c0_i32 = arith.constant 0 : i32
    %c0_i32_0 = arith.constant 0 : i32
    return %arg0, %c0_i32 : i32, i32
  }
  func.func @transform_1(%arg0: i32) -> (i32, i32) {
    %c0_i32 = arith.constant 0 : i32
    %c0_i32_0 = arith.constant 0 : i32
    %c0_i32_1 = arith.constant 0 : i32
    return %c0_i32, %c0_i32_0 : i32, i32
  }
  func.func @transform_2(%arg0: i32) -> (i32, i32) {
    %c0_i32 = arith.constant 0 : i32
    %c0_i32_0 = arith.constant 0 : i32
    %c0_i32_1 = arith.constant 0 : i32
    return %c0_i32, %c0_i32_0 : i32, i32
  }
  func.func @transform_3(%arg0: i32) -> (i32, i32) {
    %c0_i32 = arith.constant 0 : i32
    %c0_i32_0 = arith.constant 0 : i32
    %c0_i32_1 = arith.constant 0 : i32
    return %c0_i32, %c0_i32_0 : i32, i32
  }
  func.func @transform_4(%arg0: i32) -> (i32, i32) {
    %c0_i32 = arith.constant 0 : i32
    %c0_i32_0 = arith.constant 0 : i32
    %c0_i32_1 = arith.constant 0 : i32
    return %c0_i32, %c0_i32_0 : i32, i32
  }
  func.func @transform_5(%arg0: i32) -> (i32, i32) {
    %c0_i32 = arith.constant 0 : i32
    %c0_i32_0 = arith.constant 0 : i32
    %c0_i32_1 = arith.constant 0 : i32
    return %c0_i32, %c0_i32_0 : i32, i32
  }
  func.func @transform_6(%arg0: i32) -> (i32, i32) {
    %c0_i32 = arith.constant 0 : i32
    %c0_i32_0 = arith.constant 0 : i32
    %c0_i32_1 = arith.constant 0 : i32
    return %c0_i32, %c0_i32_0 : i32, i32
  }
  func.func @transform_7(%arg0: i32) -> (i32, i32) {
    %c0_i32 = arith.constant 0 : i32
    %c0_i32_0 = arith.constant 0 : i32
    return %arg0, %c0_i32 : i32, i32
  }
  func.func @transform_8(%arg0: i32) -> (i32, i32) {
    %c0_i32 = arith.constant 0 : i32
    %c0_i32_0 = arith.constant 0 : i32
    return %arg0, %c0_i32 : i32, i32
  }
}

</mosaic_0001>

<bundles_post_ra>
// kernel: tpu_custom_call.1
= control target key start
LH: loop header
LB: loop body
LE: loop exit
PB: predicated region body
PF: predicated region fallthrough
CT: control target
= control target key end

     0   :  { %14 = vsyncpa [#allocation3], 0  ;;  %s977_s0 = inlined_call_operand.hbm [shape: f32[8,128], index: 0, kind: input, shape index: {}]   ;;  %s978_s1 = inlined_call_operand.hbm [shape: f32[128,128], index: 1, kind: input, shape index: {}]   ;;  %s979_s2 = inlined_call_operand.vmem [shape: f32[1,128], index: 2, kind: input, shape index: {}]   ;;  %s980_s3 = inlined_call_operand.hbm [shape: f32[128,128], index: 3, kind: input, shape index: {}]   ;;  %s981_s4 = inlined_call_operand.vmem [shape: f32[1,128], index: 4, kind: input, shape index: {}]   ;;  %s982_s5 = inlined_call_operand.hbm [shape: f32[128,128], index: 5, kind: input, shape index: {}]   ;;  %s983_s6 = inlined_call_operand.vmem [shape: f32[1,128], index: 6, kind: input, shape index: {}]   ;;  %s984_s7 = inlined_call_operand.hbm [shape: f32[8,128], index: 7, kind: output, shape index: {0}]   ;;  %s985_s8 = inlined_call_operand.hbm [shape: f32[8,128], index: 8, kind: output, shape index: {1}]  }
   0x1   :  { %15 = vsyncpa [#allocation6], 0 }
   0x2   :  { %16 = vsyncpa [#allocation9], 0 }
   0x3   :  { %17 = vsyncpa [#allocation4], 0 }
   0x4   :  { %18 = vsyncpa [#allocation12], 0  ;;  %s801_s27 = smov [#allocation5]   ;;  %s659_s9 = scalar_lea.hbm %s978_s1, 2048 }
   0x5   :  { %s34_s28 = sshll.u32 %s801_s27, 4  ;;  %p660_p0 = scmp.ne.s32.totalorder %s978_s1, %s659_s9  ;;  %s35_s28 = int_to_ptr.vmem [resolvable:$true] %s34_s28 }
   0x6   :  { %p663_p1 = scmp.lt.u32.totalorder %s659_s9, %s978_s1 }
   0x8   :  { %p665_p2 = pnand %p663_p1, %p660_p0 }
   0xa   :  { %668 = shalt.err (!%p665_p2)
}
   0xb   :  { %s669_s14 = scalar_lea.vmem %s35_s28, 2048  ;;  %p674_p4 = scmp.lt.s32.totalorder %s35_s28, %s35_s28 }
   0xc   :  { %p670_p3 = scmp.ne.s32.totalorder %s35_s28, %s669_s14  ;;  %p675_p5 = scmp.lt.s32.totalorder %s669_s14, %s669_s14 }
   0xe   :  { %p676_p6 = por %p675_p5, %p674_p4 }
  0x10   :  { %p677_p7 = pnand %p676_p6, %p670_p3 }
  0x12   :  { %680 = shalt.err (!%p677_p7)
}
  0x13   :  { %s802_s15 = smov 128   ;;  %s803_s16 = smov 8  }
  0x14   :  { %40 = dma.hbm_to_vmem [thread:$0]  %s978_s1, 2048, %s35_s28, [#allocation6], %s802_s15, %s802_s15, %s803_s16  }
  0x15   :  { %s804_s19 = smov [#allocation2]   ;;  %s805_s21 = smov [#allocation7]  }
  0x16   :  { %s25_s20 = sshll.u32 %s804_s19, 4  ;;  %s48_s22 = sshll.u32 %s805_s21, 4  ;;  %s26_s20 = int_to_ptr.vmem [resolvable:$true] %s25_s20  ;;  %s49_s22 = int_to_ptr.vmem [resolvable:$true] %s48_s22 }
  0x17   :  { %s681_s25 = scalar_lea.hbm %s977_s0, 128 }
  0x18   :  { %p682_p8 = scmp.ne.s32.totalorder %s977_s0, %s681_s25  ;;  %p685_p9 = scmp.lt.u32.totalorder %s681_s25, %s977_s0 }
  0x1a   :  { %p687_p10 = pnand %p685_p9, %p682_p8 }
  0x1c   :  { %690 = shalt.err (!%p687_p10)
}
  0x1d   :  { %s691_s1 = scalar_lea.vmem %s26_s20, 128  ;;  %p696_p12 = scmp.lt.s32.totalorder %s26_s20, %s26_s20 }
  0x1e   :  { %p692_p11 = scmp.ne.s32.totalorder %s26_s20, %s691_s1  ;;  %p697_p13 = scmp.lt.s32.totalorder %s691_s1, %s691_s1 }
  0x20   :  { %p698_p0 = por %p697_p13, %p696_p12 }
  0x22   :  { %p699_p1 = pnand %p698_p0, %p692_p11 }
  0x24   :  { %702 = shalt.err (!%p699_p1)
}
  0x25   :  { %28 = dma.hbm_to_vmem [thread:$0]  %s977_s0, 128, %s26_s20, [#allocation3]  }
  0x26   :  { %s703_s12 = scalar_lea.hbm %s980_s3, 2048 }
  0x27   :  { %p704_p2 = scmp.ne.s32.totalorder %s980_s3, %s703_s12  ;;  %p707_p3 = scmp.lt.u32.totalorder %s703_s12, %s980_s3 }
  0x29   :  { %p709_p4 = pnand %p707_p3, %p704_p2 }
  0x2b   :  { %712 = shalt.err (!%p709_p4)
}
  0x2c   :  { %s713_s19 = scalar_lea.vmem %s49_s22, 2048  ;;  %p718_p6 = scmp.lt.s32.totalorder %s49_s22, %s49_s22 }
  0x2d   :  { %p714_p5 = scmp.ne.s32.totalorder %s49_s22, %s713_s19  ;;  %p719_p7 = scmp.lt.s32.totalorder %s713_s19, %s713_s19 }
  0x2f   :  { %p720_p8 = por %p719_p7, %p718_p6 }
  0x31   :  { %p721_p9 = pnand %p720_p8, %p714_p5 }
  0x33   :  { %724 = shalt.err (!%p721_p9)
}
  0x34   :  { %54 = dma.hbm_to_vmem [thread:$0]  %s980_s3, 2048, %s49_s22, [#allocation6], %s802_s15, %s802_s15, %s803_s16  }
  0x35   :  { %s806_s21 = smov [#allocation8]   ;;  %s725_s26 = scalar_lea.hbm %s982_s5, 2048 }
  0x36   :  { %s62_s23 = sshll.u32 %s806_s21, 4  ;;  %p726_p10 = scmp.ne.s32.totalorder %s982_s5, %s725_s26  ;;  %s63_s23 = int_to_ptr.vmem [resolvable:$true] %s62_s23 }
  0x37   :  { %p729_p11 = scmp.lt.u32.totalorder %s725_s26, %s982_s5 }
  0x39   :  { %p731_p12 = pnand %p729_p11, %p726_p10 }
  0x3b   :  { %734 = shalt.err (!%p731_p12)
}
  0x3c   :  { %s735_s28 = scalar_lea.vmem %s63_s23, 2048  ;;  %p740_p0 = scmp.lt.s32.totalorder %s63_s23, %s63_s23 }
  0x3d   :  { %p736_p13 = scmp.ne.s32.totalorder %s63_s23, %s735_s28  ;;  %p741_p1 = scmp.lt.s32.totalorder %s735_s28, %s735_s28 }
  0x3f   :  { %p742_p2 = por %p741_p1, %p740_p0 }
  0x41   :  { %p743_p3 = pnand %p742_p2, %p736_p13 }
  0x43   :  { %746 = shalt.err (!%p743_p3)
}
  0x44   :  { %68 = dma.hbm_to_vmem [thread:$0]  %s982_s5, 2048, %s63_s23, [#allocation9], %s802_s15, %s802_s15, %s803_s16  }
  0x45   :  { %791 = dma.done.wait [#allocation3], 128  }
  0x46   :  { %792 = vsyncadd [#allocation3], 4294967168 }
  0x47   :  { %793 = dma.done.wait [#allocation6], 4096  }
  0x48   :  { %794 = vsyncadd [#allocation6], 4294963200 }
  0x49   :  { %795 = dma.done.wait [#allocation9], 2048  }
  0x4a   :  { %796 = vsyncadd [#allocation9], 4294965248  ;;  %v807_v0 = vmov 0.0|0.0   ;;  %vm808_vm0 = vmmov 0   ;;  %v809_v1 = vmov 0.0   ;;  %v84_v2 = vld [vmem:[#allocation5] sm:$0xff] }
  0x4b   :  { %570 = vmatprep.subr.bf16.mxu0 %v807_v0  ;;  %497 = vmatprep.mubr.msk.f32.mxu0 %vm808_vm0, %v809_v1  ;;  %v85_v3 = vld [vmem:[#allocation5 + $0x8] sm:$0xff]  ;;  %v86_v4 = vld [vmem:[#allocation5 + $0x10] sm:$0xff]  ;;  %v87_v6 = vld [vmem:[#allocation5 + $0x18] sm:$0xff]  ;;  %s810_s12 = smov [#allocation10]  }
  0x4c   :  { %594 = vmatprep.subr.bf16.mxu1 %v807_v0  ;;  %532 = vmatprep.mubr.msk.f32.mxu1 %vm808_vm0, %v809_v1  ;;  %v571_v5 = vpack.c.bf16 %v85_v3, %v84_v2  ;;  %v574_v7 = vpack.c.bf16 %v87_v6, %v86_v4  ;;  %v88_v8 = vld [vmem:[#allocation5 + $0x20] sm:$0xff]  ;;  %v89_v9 = vld [vmem:[#allocation5 + $0x28] sm:$0xff]  ;;  %v180_v14 = vld [vmem:[#allocation7 + $0x10] sm:$0xff]  ;;  %s386_s13 = sshll.u32 %s810_s12, 4  ;;  %s387_s13 = int_to_ptr.vmem [resolvable:$true] %s386_s13 }
  0x4d   :  { %v178_v10 = vld [vmem:[#allocation7] sm:$0xff]  ;;  %v179_v11 = vld [vmem:[#allocation7 + $0x8] sm:$0xff]  ;;  %v577_v12 = vpack.c.bf16 %v89_v9, %v88_v8  ;;  %v181_v15 = vld [vmem:[#allocation7 + $0x18] sm:$0xff]  ;;  %p752_p5 = scmp.lt.s32.totalorder %s387_s13, %s387_s13 }
  0x4e   :  { %572 = vmatpush3.bf16.msra.mxu0 %v571_v5  ;;  %v595_v13 = vpack.c.bf16 %v179_v11, %v178_v10  ;;  %v90_v16 = vld [vmem:[#allocation5 + $0x30] sm:$0xff]  ;;  %v91_v17 = vld [vmem:[#allocation5 + $0x38] sm:$0xff]  ;;  %v598_v18 = vpack.c.bf16 %v181_v15, %v180_v14  ;;  %v182_v19 = vld [vmem:[#allocation7 + $0x20] sm:$0xff] }
  0x4f   :  { %573 = vmatprep.subr.bf16.mxu0 %v807_v0  ;;  %v183_v20 = vld [vmem:[#allocation7 + $0x28] sm:$0xff]  ;;  %v580_v21 = vpack.c.bf16 %v91_v17, %v90_v16  ;;  %v92_v22 = vld [vmem:[#allocation5 + $0x40] sm:$0xff]  ;;  %v184_v25 = vld [vmem:[#allocation7 + $0x30] sm:$0xff] }
  0x50   :  { %596 = vmatpush3.bf16.msra.mxu1 %v595_v13  ;;  %v93_v23 = vld [vmem:[#allocation5 + $0x48] sm:$0xff]  ;;  %v601_v24 = vpack.c.bf16 %v183_v20, %v182_v19  ;;  %v185_v26 = vld [vmem:[#allocation7 + $0x38] sm:$0xff]  ;;  %v94_v28 = vld [vmem:[#allocation5 + $0x50] sm:$0xff] }
  0x51   :  { %597 = vmatprep.subr.bf16.mxu1 %v807_v0  ;;  %v583_v27 = vpack.c.bf16 %v93_v23, %v92_v22  ;;  %v95_v29 = vld [vmem:[#allocation5 + $0x58] sm:$0xff]  ;;  %v604_v30 = vpack.c.bf16 %v185_v26, %v184_v25  ;;  %v186_v31 = vld [vmem:[#allocation7 + $0x40] sm:$0xff]  ;;  %v187_v32 = vld [vmem:[#allocation7 + $0x48] sm:$0xff] }
  0x52   :  { %575 = vmatpush3.bf16.msra.mxu0 %v574_v7  ;;  %v586_v33 = vpack.c.bf16 %v95_v29, %v94_v28  ;;  %v96_v34 = vld [vmem:[#allocation5 + $0x60] sm:$0xff]  ;;  %v97_v35 = vld [vmem:[#allocation5 + $0x68] sm:$0xff]  ;;  %v607_v36 = vpack.c.bf16 %v187_v32, %v186_v31  ;;  %v98_v38 = vld [vmem:[#allocation5 + $0x70] sm:$0xff] }
  0x53   :  { %576 = vmatprep.subr.bf16.mxu0 %v807_v0  ;;  %v589_v37 = vpack.c.bf16 %v97_v35, %v96_v34  ;;  %v99_v39 = vld [vmem:[#allocation5 + $0x78] sm:$0xff]  ;;  %v271_v41 = vld [vmem:[#allocation8] sm:$0xff]  ;;  %v272_v42 = vld [vmem:[#allocation8 + $0x8] sm:$0xff] }
  0x54   :  { %599 = vmatpush3.bf16.msra.mxu1 %v598_v18  ;;  %v592_v40 = vpack.c.bf16 %v99_v39, %v98_v38  ;;  %v83_v43 = vld [vmem:[#allocation2] sm:$0xff]  ;;  %v619_v44 = vpack.c.bf16 %v272_v42, %v271_v41  ;;  %v273_v45 = vld [vmem:[#allocation8 + $0x10] sm:$0xff]  ;;  %v275_v48 = vld [vmem:[#allocation8 + $0x20] sm:$0xff] }
  0x55   :  { %600 = vmatprep.subr.bf16.mxu1 %v807_v0  ;;  %v274_v46 = vld [vmem:[#allocation8 + $0x18] sm:$0xff]  ;;  %v276_v49 = vld [vmem:[#allocation8 + $0x28] sm:$0xff]  ;;  %v277_v51 = vld [vmem:[#allocation8 + $0x30] sm:$0xff] }
  0x56   :  { %578 = vmatpush3.bf16.msra.mxu0 %v577_v12  ;;  %v622_v47 = vpack.c.bf16 %v274_v46, %v273_v45  ;;  %v625_v50 = vpack.c.bf16 %v276_v49, %v275_v48  ;;  %v278_v52 = vld [vmem:[#allocation8 + $0x38] sm:$0xff]  ;;  %v279_v54 = vld [vmem:[#allocation8 + $0x40] sm:$0xff]  ;;  %v280_v55 = vld [vmem:[#allocation8 + $0x48] sm:$0xff] }
  0x57   :  { %579 = vmatprep.subr.bf16.mxu0 %v807_v0  ;;  %v628_v53 = vpack.c.bf16 %v278_v52, %v277_v51  ;;  %v631_v56 = vpack.c.bf16 %v280_v55, %v279_v54  ;;  %v188_v57 = vld [vmem:[#allocation7 + $0x50] sm:$0xff]  ;;  %v189_v58 = vld [vmem:[#allocation7 + $0x58] sm:$0xff]  ;;  %v190_v63 = vld [vmem:[#allocation7 + $0x60] sm:$0xff] }
  0x58   :  { %602 = vmatpush3.bf16.msra.mxu1 %v601_v24  ;;  %v281_v59 = vld [vmem:[#allocation8 + $0x50] sm:$0xff]  ;;  %v610_v60 = vpack.c.bf16 %v189_v58, %v188_v57  ;;  %v282_v61 = vld [vmem:[#allocation8 + $0x58] sm:$0xff]  ;;  %v283_v2 = vld [vmem:[#allocation8 + $0x60] sm:$0xff] }
  0x59   :  { %603 = vmatprep.subr.bf16.mxu1 %v807_v0  ;;  %v634_v62 = vpack.c.bf16 %v282_v61, %v281_v59  ;;  %v284_v4 = vld [vmem:[#allocation8 + $0x68] sm:$0xff]  ;;  %v192_v5 = vld [vmem:[#allocation7 + $0x70] sm:$0xff]  ;;  %v193_v6 = vld [vmem:[#allocation7 + $0x78] sm:$0xff] }
  0x5a   :  { %581 = vmatpush3.bf16.msra.mxu0 %v580_v21  ;;  %v637_v7 = vpack.c.bf16 %v284_v4, %v283_v2  ;;  %v285_v8 = vld [vmem:[#allocation8 + $0x70] sm:$0xff]  ;;  %v286_v9 = vld [vmem:[#allocation8 + $0x78] sm:$0xff]  ;;  %v616_v10 = vpack.c.bf16 %v193_v6, %v192_v5 }
  0x5b   :  { %582 = vmatprep.subr.bf16.mxu0 %v807_v0  ;;  %v640_v11 = vpack.c.bf16 %v286_v9, %v285_v8  ;;  %v411_v12 = vld [vmem:[%s979_s2] ss:$0 sm:$0xff]  ;;  %s747_s2 = scalar_lea.vmem %s387_s13, 128 }
  0x5c   :  { %605 = vmatpush3.bf16.msra.mxu1 %v604_v30  ;;  %v412_v17 = vld [vmem:[%s981_s4] ss:$0 sm:$0xff]  ;;  %p748_p4 = scmp.ne.s32.totalorder %s387_s13, %s747_s2  ;;  %p753_p6 = scmp.lt.s32.totalorder %s747_s2, %s747_s2 }
  0x5d   :  { %606 = vmatprep.subr.bf16.mxu1 %v807_v0 }
  0x5e   :  { %584 = vmatpush3.bf16.msra.mxu0 %v583_v27  ;;  %p754_p7 = por %p753_p6, %p752_p5 }
  0x5f   :  { %585 = vmatprep.subr.bf16.mxu0 %v807_v0 }
  0x60   :  { %608 = vmatpush3.bf16.msra.mxu1 %v607_v36  ;;  %p755_p8 = pnand %p754_p7, %p748_p4 }
  0x61   :  { %609 = vmatprep.subr.bf16.mxu1 %v807_v0 }
  0x62   :  { %587 = vmatpush3.bf16.msra.mxu0 %v586_v33 }
  0x63   :  { %588 = vmatprep.subr.bf16.mxu0 %v807_v0 }
  0x64   :  { %611 = vmatpush3.bf16.msra.mxu1 %v610_v60 }
  0x65   :  { %612 = vmatprep.subr.bf16.mxu1 %v807_v0 }
  0x66   :  { %590 = vmatpush3.bf16.msra.mxu0 %v589_v37 }
  0x67   :  { %591 = vmatprep.subr.bf16.mxu0 %v807_v0 }
  0x6a   :  { %593 = vmatpush3.bf16.msra.mxu0 %v592_v40 }
  0x6b   :  { %618 = vmatprep.subr.bf16.mxu0 %v807_v0 }
  0x6d   :  { %498 = vmatmul.mubr.f32.vlgmr.msra.gmra.mrb[0].mxu0 %v83_v43 }
  0x6e   :  { %620 = vmatpush3.bf16.msra.mxu0 %v619_v44  ;;  %567 = vmatprep.mubr.msk.f32.mxu0 %vm808_vm0, %v809_v1  ;;  %v191_v1 = vld [vmem:[#allocation7 + $0x68] sm:$0xff] }
  0x6f   :  { %621 = vmatprep.subr.bf16.mxu0 %v807_v0  ;;  %v613_v3 = vpack.c.bf16 %v191_v1, %v190_v63 }
  0x71   :  { %614 = vmatpush3.bf16.msra.mxu1 %v613_v3 }
  0x72   :  { %623 = vmatpush3.bf16.msra.mxu0 %v622_v47  ;;  %615 = vmatprep.subr.bf16.mxu1 %v807_v0 }
  0x73   :  { %624 = vmatprep.subr.bf16.mxu0 %v807_v0 }
  0x75   :  { %617 = vmatpush3.bf16.msra.mxu1 %v616_v10 }
  0x76   :  { %626 = vmatpush3.bf16.msra.mxu0 %v625_v50 }
  0x77   :  { %627 = vmatprep.subr.bf16.mxu0 %v807_v0 }
  0x7a   :  { %629 = vmatpush3.bf16.msra.mxu0 %v628_v53 }
  0x7b   :  { %630 = vmatprep.subr.bf16.mxu0 %v807_v0 }
  0x7e   :  { %632 = vmatpush3.bf16.msra.mxu0 %v631_v56 }
  0x7f   :  { %633 = vmatprep.subr.bf16.mxu0 %v807_v0 }
  0x82   :  { %635 = vmatpush3.bf16.msra.mxu0 %v634_v62 }
  0x83   :  { %636 = vmatprep.subr.bf16.mxu0 %v807_v0 }
  0x86   :  { %638 = vmatpush3.bf16.msra.mxu0 %v637_v7 }
  0x87   :  { %639 = vmatprep.subr.bf16.mxu0 %v807_v0  ;;  %v413_v0 = vld [vmem:[%s983_s6] ss:$0 sm:$0xff] }
  0x8a   :  { %641 = vmatpush3.bf16.msra.mxu0 %v640_v11 }
 0x140   :  { %v173_v13 = vpop.f32.mrb[0].mxu0 }
 0x141   :  { %v174_v14 = vadd.f32 %v411_v12, %v173_v13  ;;  %v499_v15 = vpop.f32.mrb[1].mxu0 }
 0x143   :  { %653 = vtanh.f32 %v174_v14 }
 0x14d   :  { %v654_v16 = vpop.eup %653 }
 0x14e   :  { %533 = vmatmul.mubr.f32.vlgmr.msra.gmra.mrb[0].mxu1 %v654_v16  ;;  %568 = vmatmul.mubr.f32.vlgmr.msra.gmra.mrb[2].mxu0 %v654_v16 }
 0x221   :  { %v267_v18 = vpop.f32.mrb[0].mxu1  ;;  %v360_v19 = vpop.f32.mrb[2].mxu0 }
 0x222   :  { %v268_v20 = vadd.f32 %v412_v17, %v267_v18  ;;  %v361_v21 = vadd.f32 %v413_v0, %v360_v19  ;;  %v534_v22 = vpop.f32.mrb[1].mxu1  ;;  %v569_v23 = vpop.f32.mrb[3].mxu0 }
 0x224   :  { %378 = vst [vmem:[#allocation10] sm:$0xff] %v268_v20  ;;  %v365_v24 = vmin.f32 %v361_v21, 20.0 }
 0x225   :  { %758 = shalt.err (!%p755_p8)
}
 0x226   :  { %s759_s14 = scalar_lea.hbm %s984_s7, 128 }
 0x227   :  { %p760_p9 = scmp.ne.s32.totalorder %s984_s7, %s759_s14  ;;  %p763_p10 = scmp.lt.u32.totalorder %s759_s14, %s984_s7 }
 0x229   :  { %p765_p11 = pnand %p763_p10, %p760_p9 }
 0x22b   :  { %768 = shalt.err (!%p765_p11)
}
 0x22c   :  { %389 = dma.vmem_to_hbm [thread:$0]  %s387_s13, 128, %s984_s7, [#allocation4]   ;;  %v366_v25 = vmul.f32 1.442695, %v365_v24  ;;  %vm364_vm2 = vcmp.gt.f32.partialorder %v361_v21, 20.0 }
 0x22d   :  { %s811_s23 = smov [#allocation11]  }
 0x22e   :  { %655 = vpow2.f32 %v366_v25  ;;  %s396_s24 = sshll.u32 %s811_s23, 4  ;;  %s397_s24 = int_to_ptr.vmem [resolvable:$true] %s396_s24 }
 0x22f   :  { %s769_s7 = scalar_lea.vmem %s397_s24, 128  ;;  %p774_p13 = scmp.lt.s32.totalorder %s397_s24, %s397_s24 }
 0x230   :  { %p770_p12 = scmp.ne.s32.totalorder %s397_s24, %s769_s7  ;;  %p775_p0 = scmp.lt.s32.totalorder %s769_s7, %s769_s7 }
 0x232   :  { %p776_p1 = por %p775_p0, %p774_p13 }
 0x234   :  { %p777_p2 = pnand %p776_p1, %p770_p12 }
 0x238   :  { %v656_v26 = vpop.eup %655 }
 0x239   :  { %v368_v27 = vadd.f32 1.0, %v656_v26  ;;  %v371_v28 = vmul.f32 -0.5, %v656_v26  ;;  %v374_v30 = vand.u32 2147483647, %v656_v26 }
 0x23b   :  { %657 = vlog2.f32 %v368_v27  ;;  %v372_v29 = vadd.f32 1.0, %v371_v28  ;;  %vm375_vm1 = vcmp.lt.f32.partialorder %v374_v30, 0.0004427343 }
 0x23d   :  { %v373_v33 = vmul.f32 %v656_v26, %v372_v29 }
 0x245   :  { %v658_v31 = vpop.eup %657 }
 0x246   :  { %v370_v32 = vmul.f32 0.6931472, %v658_v31 }
 0x248   :  { %v376_v34 = vsel %vm375_vm1, %v373_v33, %v370_v32 }
 0x249   :  { %v377_v35 = vsel %vm364_vm2, %v361_v21, %v376_v34 }
 0x24a   :  { %379 = vst [vmem:[#allocation11] sm:$0xff] %v377_v35 }
 0x24b   :  { %780 = shalt.err (!%p777_p2)
}
 0x24c   :  { %s781_s27 = scalar_lea.hbm %s985_s8, 128 }
 0x24d   :  { %p782_p3 = scmp.ne.s32.totalorder %s985_s8, %s781_s27  ;;  %p785_p4 = scmp.lt.u32.totalorder %s781_s27, %s985_s8 }
 0x24f   :  { %p787_p5 = pnand %p785_p4, %p782_p3 }
 0x251   :  { %790 = shalt.err (!%p787_p5)
}
 0x252   :  { %399 = dma.vmem_to_hbm [thread:$0]  %s397_s24, 128, %s985_s8, [#allocation12]  }
 0x253   :  { %797 = dma.done.wait [#allocation4], 128  }
 0x254   :  { %798 = vsyncadd [#allocation4], 4294967168 }
 0x255   :  { %799 = dma.done.wait [#allocation12], 128  }
 0x256   :  { %800 = vsyncadd [#allocation12], 4294967168 }
 0x257   :  { %406 = vsyncpa [#allocation3], 1 }
 0x258   :  { %407 = vsyncpa [#allocation6], 1 }
 0x259   :  { %408 = vsyncpa [#allocation9], 1 }
 0x25a   :  { %409 = vsyncpa [#allocation4], 1 }
 0x25b   :  { %410 = vsyncpa [#allocation12], 1 }

</bundles_post_ra>
